<compile_context>
chip_gen: v7x
topology: tpu7x:2x2x1
jax: 0.10.0
libtpu: 0.0.40
codegen_flags: <defaults>
</compile_context>

<pallas_src>
import functools
import math

import jax
import jax.numpy as jnp
from jax.experimental import pallas as pl
from jax.experimental.pallas import tpu as pltpu


def _round_up(x, m):
    return -(-x // m) * m


def _ls_focal_kernel(pred_ref, tgt_ref, expand_ref, cls_ref, out_ref, *,
                     gamma, alpha, smoothing, num_classes, valid_rows,
                     tile_rows):
    pred = pred_ref[...].astype(jnp.float32)        # (TR, W) logits
    tgt = tgt_ref[...].astype(jnp.float32)          # (TR, SPR) labels in [0, C]; -1 = pad

    # Expand each sample's label across its C lanes on the (otherwise idle) MXU:
    # expand_ref[s, j] == 1.0 iff lane j belongs to sample-slot s.  All values are
    # small integers, so the matmul result is exact and f32 '==' compares are safe.
    lab = jnp.dot(tgt, expand_ref[...], preferred_element_type=jnp.float32)  # (TR, W)
    t = (lab == cls_ref[...]).astype(jnp.float32)   # one-hot indicator (label==C -> all 0)
    valid = lab >= 0.0                              # -1 sentinel marks padded samples

    # Ragged last tile: mask rows past the end of the (un-padded) row count.
    if valid_rows % tile_rows != 0:
        row = jax.lax.broadcasted_iota(jnp.int32, (tile_rows, 1), 0)
        row_ok = row < (valid_rows - pl.program_id(0) * tile_rows)
        valid = jnp.logical_and(valid, row_ok)

    # label smoothing: ts = t*(1-s) + (1-t)*s/(C-1) = off + k1*t
    off = smoothing / (num_classes - 1)
    k1 = 1.0 - smoothing - off
    ts = off + k1 * t

    # sigmoid via one shared exp:  e = exp(-|x|); sig = 1/(1+e) (x>=0) or e/(1+e)
    e = jnp.exp(-jnp.abs(pred))                     # EUP #1
    d = 1.0 + e
    r = pl.reciprocal(d, approx=True)               # EUP #2 (cheap vrcp)
    r = r * (2.0 - d * r)                           # one Newton refine (plenty for 1e-4)
    sig = jnp.where(pred >= 0.0, r, e * r)

    # pt = (1-sig)*ts + sig*(1-ts)  ==  ts + sig*(1 - 2*ts)
    pt = ts + sig * (1.0 - 2.0 * ts)
    if gamma == 2.0:                                # common case: no pow on the EUP
        pt_g = pt * pt
    elif gamma == 1.0:
        pt_g = pt
    elif float(gamma).is_integer() and 1.0 < gamma <= 8.0:
        pt_g = pt
        for _ in range(int(gamma) - 1):
            pt_g = pt_g * pt
    else:
        pt_g = pt ** gamma                          # fallback (log+exp on EUP)
    # alpha*t + (1-alpha)*(1-t)  ==  (1-alpha) + (2*alpha-1)*t
    focal_weight = ((1.0 - alpha) + (2.0 * alpha - 1.0) * t) * pt_g

    # stable BCE-with-logits: max(x,0) - x*z + log1p(exp(-|x|))
    bce = jnp.maximum(pred, 0.0) - pred * ts + jnp.log1p(e)   # EUP #3

    loss = jnp.where(valid, bce * focal_weight, 0.0)

    # Lane-dense (8, W) partial sums (whole sublane-tile groups, layout-preserving);
    # the final tiny reduction happens outside the kernel.
    tr, w = loss.shape
    out_ref[...] = jnp.sum(loss.reshape(tr // 8, 8, w), axis=0)


def ls_focal_loss(pred, target, *, gamma=2.0, alpha=0.25, smoothing=0.1,
                  loss_weight=1.0, reduction="mean", max_lane_width=512):
    """Pallas TPU implementation of LSFocalLoss.forward (weight=None, avg_factor=None).

    pred:   (N, C) logits, any float dtype (bf16 recommended on v5e).
    target: (N,) integer labels in [0, C]; label == C means background.
    """
    assert reduction in ("mean", "sum")
    # TODO(synk): reduction='none', per-sample `weight`, and `avg_factor` overrides
    # are not implemented in-kernel (only the fused mean/sum scalar path).
    n, c = pred.shape
    assert c >= 2, "label smoothing needs num_classes >= 2"
    total = n * c

    # ---- lane-dense flat layout: (rows, lane_width), lane_width % 128 == 0, % C == 0.
    base = (c * 128) // math.gcd(c, 128)                   # lcm(C, 128)
    lane_width = base
    if base <= max_lane_width:
        for mult in range(max_lane_width // base, 0, -1):  # widest width N's divisibility allows
            if n % ((base * mult) // c) == 0:
                lane_width = base * mult
                break
    spr = lane_width // c                                  # samples per flat row

    tgt_i32 = target.astype(jnp.int32).reshape(-1)
    n_eff = n
    if n % spr != 0 or n < 8 * spr:
        # TODO(synk): rare fallback — full-array pad copy; avoidable with a second,
        # smaller pallas_call over the ragged tail.
        n_eff = max(_round_up(n, spr), 8 * spr)
        pred = jnp.pad(pred, ((0, n_eff - n), (0, 0)))
        tgt_i32 = jnp.pad(tgt_i32, (0, n_eff - n), constant_values=-1)

    rows = (n_eff * c) // lane_width
    pred2d = pred.reshape(rows, lane_width)                # contiguous reshape: no copy
    tgt2d = tgt_i32.reshape(rows, spr)

    # Tiny constant side inputs (constant index_map -> stay resident across grid steps).
    lane = jnp.arange(lane_width, dtype=jnp.int32)
    lane_cls = (lane % c).astype(jnp.float32).reshape(1, lane_width)
    expand = (jnp.arange(spr, dtype=jnp.int32)[:, None]
              == (lane // c)[None, :]).astype(jnp.float32)  # (spr, lane_width)

    # ---- tile size: ~1 MiB f32 per block (amortizes ~0.35us/step), capped so both
    # v7x TensorCores get work when there are enough rows; rows multiple of 8.
    budget_rows = max(8, (262144 // lane_width) // 8 * 8)
    tile_rows = max(8, min(budget_rows, (rows // 8) * 8))
    if rows >= 64:
        tile_rows = min(tile_rows, _round_up(-(-rows // 2), 8))
    num_tiles = -(-rows // tile_rows)

    kernel = functools.partial(
        _ls_focal_kernel, gamma=float(gamma), alpha=float(alpha),
        smoothing=float(smoothing), num_classes=c, valid_rows=rows,
        tile_rows=tile_rows)

    partials = pl.pallas_call(
        kernel,
        out_shape=jax.ShapeDtypeStruct((num_tiles * 8, lane_width), jnp.float32),
        grid_spec=pltpu.PrefetchScalarGridSpec(
            num_scalar_prefetch=0,
            grid=(num_tiles,),
            in_specs=[
                pl.BlockSpec((tile_rows, lane_width), lambda i: (i, 0)),
                pl.BlockSpec((tile_rows, spr), lambda i: (i, 0)),
                pl.BlockSpec((spr, lane_width), lambda i: (0, 0)),
                pl.BlockSpec((1, lane_width), lambda i: (0, 0)),
            ],
            out_specs=pl.BlockSpec((8, lane_width), lambda i: (i, 0)),
        ),
        compiler_params=pltpu.CompilerParams(
            dimension_semantics=("parallel",),   # independent tiles; both TCs on v7x
            vmem_limit_bytes=48 * 1024 * 1024),
    )(pred2d, tgt2d, expand, lane_cls)

    loss_sum = jnp.sum(partials)
    if reduction == "mean":
        loss_sum = loss_sum / jnp.float32(total)
    return jnp.float32(loss_weight) * loss_sum


def _reference(pred, target, *, gamma=2.0, alpha=0.25, smoothing=0.1,
               loss_weight=1.0):
    num_classes = pred.shape[1]
    t = jax.nn.one_hot(target.astype(jnp.int32), num_classes + 1,
                       dtype=jnp.float32)[:, :num_classes]
    ts = t * (1 - smoothing) + (1 - t) * smoothing / (num_classes - 1)
    p = jax.nn.sigmoid(pred.astype(jnp.float32))
    pt = (1 - p) * ts + p * (1 - ts)
    fw = (alpha * t + (1 - alpha) * (1 - t)) * pt ** gamma
    bce = jnp.maximum(pred, 0) - pred * ts + jnp.log1p(jnp.exp(-jnp.abs(pred)))
    return loss_weight * jnp.mean(bce * fw)


if __name__ == "__main__":
    key = jax.random.PRNGKey(0)
    k1, k2 = jax.random.split(key)

    # N deliberately not a multiple of 32 so the zero-copy (rows, 128) layout,
    # the two-tile "parallel" grid and the ragged-row masking all get exercised.
    N, C = 1000, 16
    pred = jax.random.normal(k1, (N, C), dtype=jnp.float32) * 2.0
    # labels in [0, C]; label == C means background (all-zero one-hot row)
    target = jax.random.randint(k2, (N,), 0, C + 1, dtype=jnp.int32)

    out = ls_focal_loss(pred, target, gamma=2.0, alpha=0.25, smoothing=0.1,
                        loss_weight=1.0)
    out = jax.block_until_ready(out)

    ref = _reference(pred, target)
    assert jnp.allclose(out, ref, rtol=1e-4, atol=1e-6), (out, ref)

    print("KERNEL_OK")
</pallas_src>

<mosaic_0001>
module attributes {stable_mosaic.version = 11 : i64} {
  func.func @_ls_focal_kernel(%arg0: i32, %arg1: memref<64x128xf32, #tpu.memory_space<vmem>>, %arg2: memref<64x8xi32, #tpu.memory_space<vmem>>, %arg3: memref<8x128xf32, #tpu.memory_space<vmem>>, %arg4: memref<1x128xf32, #tpu.memory_space<vmem>>, %arg5: memref<8x128xf32, #tpu.memory_space<vmem>>) attributes {dimension_semantics = [#tpu.dimension_semantics<parallel>], iteration_bounds = array<i64: 2>, scalar_prefetch = 0 : i64, scratch_operands = 0 : i64, tpu.core_type = #tpu.core_type<tc>, window_params = [{transform_indices = @transform_0, window_bounds = array<i64: 64, 128>}, {transform_indices = @transform_1, window_bounds = array<i64: 64, 8>}, {pipeline_mode = #tpu.pipeline_mode<synchronous>, transform_indices = @transform_2, window_bounds = array<i64: 8, 128>}, {pipeline_mode = #tpu.pipeline_mode<synchronous>, transform_indices = @transform_3, window_bounds = array<i64: 1, 128>}, {transform_indices = @transform_4, window_bounds = array<i64: 8, 128>}]} {
    %c0 = arith.constant 0 : index
    %c0_0 = arith.constant 0 : index
    %0 = vector.load %arg1[%c0, %c0_0] : memref<64x128xf32, #tpu.memory_space<vmem>>, vector<64x128xf32>
    %c0_1 = arith.constant 0 : index
    %c0_2 = arith.constant 0 : index
    %1 = vector.load %arg2[%c0_1, %c0_2] : memref<64x8xi32, #tpu.memory_space<vmem>>, vector<64x8xi32>
    %2 = arith.sitofp %1 : vector<64x8xi32> to vector<64x8xf32>
    %c0_3 = arith.constant 0 : index
    %c0_4 = arith.constant 0 : index
    %3 = vector.load %arg3[%c0_3, %c0_4] : memref<8x128xf32, #tpu.memory_space<vmem>>, vector<8x128xf32>
    %cst = arith.constant dense<0.000000e+00> : vector<64x128xf32>
    %4 = tpu.matmul %2, %3, %cst {dimension_numbers = #tpu.dot_dimension_numbers<[1], [0], [0], [1], [0, 0, 1, 1], [], []>} : vector<64x8xf32>, vector<8x128xf32>, vector<64x128xf32> -> vector<64x128xf32>
    %c0_5 = arith.constant 0 : index
    %c0_6 = arith.constant 0 : index
    %5 = vector.load %arg4[%c0_5, %c0_6] : memref<1x128xf32, #tpu.memory_space<vmem>>, vector<1x128xf32>
    %6 = vector.broadcast %5 : vector<1x128xf32> to vector<64x128xf32>
    %7 = arith.cmpf oeq, %4, %6 : vector<64x128xf32>
    %8 = arith.extui %7 : vector<64x128xi1> to vector<64x128xi32>
    %9 = arith.sitofp %8 : vector<64x128xi32> to vector<64x128xf32>
    %cst_7 = arith.constant 0.000000e+00 : f32
    %10 = vector.broadcast %cst_7 : f32 to vector<64x128xf32>
    %11 = arith.cmpf oge, %4, %10 : vector<64x128xf32>
    %12 = tpu.iota {dimensions = array<i32: 0>} : vector<64x1xi32>
    %c64_i32 = arith.constant 64 : i32
    %13 = arith.muli %arg0, %c64_i32 : i32
    %c125_i32 = arith.constant 125 : i32
    %14 = arith.subi %c125_i32, %13 : i32
    %15 = vector.broadcast %14 : i32 to vector<64x1xi32>
    %16 = arith.cmpi slt, %12, %15 : vector<64x1xi32>
    %17 = vector.broadcast %16 : vector<64x1xi1> to vector<64x128xi1>
    %18 = arith.andi %11, %17 : vector<64x128xi1>
    %cst_8 = arith.constant 0.893333315 : f32
    %19 = vector.broadcast %cst_8 : f32 to vector<64x128xf32>
    %20 = arith.mulf %19, %9 : vector<64x128xf32>
    %cst_9 = arith.constant 0.00666666683 : f32
    %21 = vector.broadcast %cst_9 : f32 to vector<64x128xf32>
    %22 = arith.addf %21, %20 : vector<64x128xf32>
    %23 = math.absf %0 : vector<64x128xf32>
    %cst_10 = arith.constant 0.000000e+00 : f32
    %24 = vector.broadcast %cst_10 : f32 to vector<64x128xf32>
    %25 = arith.subf %24, %23 : vector<64x128xf32>
    %26 = math.exp %25 : vector<64x128xf32>
    %cst_11 = arith.constant 1.000000e+00 : f32
    %27 = vector.broadcast %cst_11 : f32 to vector<64x128xf32>
    %28 = arith.addf %27, %26 : vector<64x128xf32>
    %29 = tpu.reciprocal %28 {approx = true} : vector<64x128xf32> -> vector<64x128xf32>
    %30 = arith.mulf %28, %29 : vector<64x128xf32>
    %cst_12 = arith.constant 2.000000e+00 : f32
    %31 = vector.broadcast %cst_12 : f32 to vector<64x128xf32>
    %32 = arith.subf %31, %30 : vector<64x128xf32>
    %33 = arith.mulf %29, %32 : vector<64x128xf32>
    %cst_13 = arith.constant 0.000000e+00 : f32
    %34 = vector.broadcast %cst_13 : f32 to vector<64x128xf32>
    %35 = arith.cmpf oge, %0, %34 : vector<64x128xf32>
    %36 = arith.mulf %26, %33 : vector<64x128xf32>
    %37 = arith.select %35, %33, %36 : vector<64x128xi1>, vector<64x128xf32>
    %cst_14 = arith.constant 2.000000e+00 : f32
    %38 = vector.broadcast %cst_14 : f32 to vector<64x128xf32>
    %39 = arith.mulf %38, %22 : vector<64x128xf32>
    %cst_15 = arith.constant 1.000000e+00 : f32
    %40 = vector.broadcast %cst_15 : f32 to vector<64x128xf32>
    %41 = arith.subf %40, %39 : vector<64x128xf32>
    %42 = arith.mulf %37, %41 : vector<64x128xf32>
    %43 = arith.addf %22, %42 : vector<64x128xf32>
    %44 = arith.mulf %43, %43 : vector<64x128xf32>
    %cst_16 = arith.constant -5.000000e-01 : f32
    %45 = vector.broadcast %cst_16 : f32 to vector<64x128xf32>
    %46 = arith.mulf %45, %9 : vector<64x128xf32>
    %cst_17 = arith.constant 7.500000e-01 : f32
    %47 = vector.broadcast %cst_17 : f32 to vector<64x128xf32>
    %48 = arith.addf %47, %46 : vector<64x128xf32>
    %49 = arith.mulf %48, %44 : vector<64x128xf32>
    %cst_18 = arith.constant 0.000000e+00 : f32
    %50 = vector.broadcast %cst_18 : f32 to vector<64x128xf32>
    %51 = arith.maximumf %0, %50 : vector<64x128xf32>
    %52 = arith.mulf %0, %22 : vector<64x128xf32>
    %53 = arith.subf %51, %52 : vector<64x128xf32>
    %54 = math.log1p %26 : vector<64x128xf32>
    %55 = arith.addf %53, %54 : vector<64x128xf32>
    %56 = arith.mulf %55, %49 : vector<64x128xf32>
    %cst_19 = arith.constant 0.000000e+00 : f32
    %57 = vector.broadcast %cst_19 : f32 to vector<64x128xf32>
    %58 = arith.select %18, %56, %57 : vector<64x128xi1>, vector<64x128xf32>
    %59 = vector.shape_cast %58 : vector<64x128xf32> to vector<8x8x128xf32>
    %cst_20 = arith.constant dense<0.000000e+00> : vector<8x128xf32>
    %60 = vector.multi_reduction <add>, %59, %cst_20 [0] : vector<8x8x128xf32> to vector<8x128xf32>
    %c0_21 = arith.constant 0 : index
    %c0_22 = arith.constant 0 : index
    %61 = vector.load %arg5[%c0_21, %c0_22] : memref<8x128xf32, #tpu.memory_space<vmem>>, vector<8x128xf32>
    tpu.vector_store %arg5[%c0_21, %c0_22], %60 {strides = array<i32>} : memref<8x128xf32, #tpu.memory_space<vmem>>, vector<8x128xf32>,
    return
  }
  func.func @transform_0(%arg0: i32) -> (i32, i32) {
    %c0_i32 = arith.constant 0 : i32
    %c0_i32_0 = arith.constant 0 : i32
    return %arg0, %c0_i32 : i32, i32
  }
  func.func @transform_1(%arg0: i32) -> (i32, i32) {
    %c0_i32 = arith.constant 0 : i32
    %c0_i32_0 = arith.constant 0 : i32
    return %arg0, %c0_i32 : i32, i32
  }
  func.func @transform_2(%arg0: i32) -> (i32, i32) {
    %c0_i32 = arith.constant 0 : i32
    %c0_i32_0 = arith.constant 0 : i32
    %c0_i32_1 = arith.constant 0 : i32
    return %c0_i32, %c0_i32_0 : i32, i32
  }
  func.func @transform_3(%arg0: i32) -> (i32, i32) {
    %c0_i32 = arith.constant 0 : i32
    %c0_i32_0 = arith.constant 0 : i32
    %c0_i32_1 = arith.constant 0 : i32
    return %c0_i32, %c0_i32_0 : i32, i32
  }
  func.func @transform_4(%arg0: i32) -> (i32, i32) {
    %c0_i32 = arith.constant 0 : i32
    %c0_i32_0 = arith.constant 0 : i32
    return %arg0, %c0_i32 : i32, i32
  }
}

</mosaic_0001>

<bundles_post_ra>
// kernel: tpu_custom_call.1
= control target key start
LH: loop header
LB: loop body
LE: loop exit
PB: predicated region body
PF: predicated region fallthrough
CT: control target
= control target key end

     0   :  { %9 = vsyncpa [#allocation3], 0  ;;  %s1673_s0 = inlined_call_operand.vmem [shape: f32[125,128], index: 0, kind: input, shape index: {}]   ;;  %s1674_s1 = inlined_call_operand.vmem [shape: s32[125,8], index: 1, kind: input, shape index: {}]   ;;  %s1675_s2 = inlined_call_operand.vmem [shape: f32[8,128], index: 2, kind: input, shape index: {}]   ;;  %s1676_s3 = inlined_call_operand.vmem [shape: f32[1,128], index: 3, kind: input, shape index: {}]   ;;  %s1677_s4 = inlined_call_operand.hbm [shape: f32[16,128], index: 4, kind: output, shape index: {}]  }
   0x1   :  { %11 = vsyncpa [#allocation3 + $0x1], 0  ;;  %s1082_s15 = smov 0   ;;  %s1084_s16 = smov 0  }
   0x2   :  { %s1086_s17 = smov 0   ;;  %s1088_s18 = smov 0  }
   0x3 LB: > { %s1103_s19 = sadd.s32 4294967295, %s1053_s18   ;;  %s847_s20 = sadd.s32 4294967294, %s1053_s18   ;;  %s1053_s18 = sphi %s1088_s18, %s1772_s18   ;;  %s1049_s17 = sphi %s1086_s17, %s1771_s17   ;;  %s1045_s16 = sphi %s1084_s16, %s1770_s16   ;;  %s1041_s15 = sphi %s1082_s15, %s1769_s15  }
   0x4   : > { %s1107_s21 = sadd.s32 1, %s1053_s18   ;;  %s118_s22 = sadd.s32 1, %s1049_s17 }
   0x5   : > { %s115_s23 = ssub.s32 %s1053_s18, %s1107_s21  ;;  %p128_p0 = scmp.ne.s32.totalorder %s1049_s17, %s1045_s16 }
   0x6   : > { %p116_p1 = scmp.eq.s32.totalorder %s115_s23, 0  ;;  %p129_p2 = scmp.eq.s32.totalorder %s1103_s19, 1 }
   0x7   : > { %p134_p3 = scmp.ne.s32.totalorder %s1045_s16, %s1041_s15  ;;  %p135_p4 = scmp.eq.s32.totalorder %s847_s20, 1 }
   0x8   : > { %s1118_s24 = scalar_select %p116_p1, %s1049_s17, %s118_s22  }
   0x9   : > { %p1120_p5 = por %p129_p2, %p128_p0  ;;  %p1124_p6 = por %p135_p4, %p134_p3 }
   0xa   : > { %p850_p7 = scmp.ge.s32.totalorder %s1053_s18, 1  ;;  %p177_p8 = scmp.lt.s32.totalorder %s1053_s18, 3 }
   0xc   : > { %p178_p9 = pnand %p850_p7, %p177_p8 }
   0xe   : > { %181 = sbr.rel (%p178_p9) target bundleno = 317 (0x13d), region = 36 }
  0x15   : > { %v244_v0 = vld [vmem:[%s1675_s2] sm:$0xff]  ;;  %s852_s29 = sshll.u32 %s1103_s19, 3  ;;  %vm245_vm0 = vcmask 64512   ;;  %v414_v62 = vlaneseq  ;;  %s873_s11 = sshll.u32 %s1103_s19, 6 }
  0x16   : > { %887 = vmatprep.subr.mxu0 %v244_v0  ;;  %901 = vmatprep.subr.mxu1 %v244_v0  ;;  %p209_p10 = scmp.lt.s32.totalorder %s852_s29, 15  ;;  %s424_s12 = ssub.s32 125, %s873_s11 }
  0x17   : > { %888 = vmatpush3.msra.mxu0 %v244_v0  ;;  %902 = vmatpush3.msra.mxu1 %v244_v0  ;;  %s205_s20 = sand.u32 1, %s1045_s16   ;;  %s875_s23 = sshll.u32 %s1103_s19, 7 }
  0x18   : > { %s1774_s29 = smov (!%p209_p10, %s852_s29), 15  ;;  %s851_s22 = sshll.u32 %s205_s20, 3 }
  0x19   : > { %s853_s30 = sshll.u32 %s1774_s29, 3  ;;  %s207_s27 = scalar_lea.vmem [#allocation2], %s851_s22 }
  0x1a   : > { %s218_s7 = scalar_lea.vmem %s1674_s1, %s853_s30  ;;  %s1151_s10 = scalar_lea.vmem %s1673_s0, %s853_s30 }
  0x1b   : > { %v228_v1 = vld [vmem:[%s218_s7] sm:$0xff]  ;;  %v229_v3 = vld [vmem:[%s218_s7 + $0x8] sm:$0xff]  ;;  %v230_v8 = vld [vmem:[%s218_s7 + $0x10] sm:$0xff]  ;;  %s776_s28 = sshll.u32 %s207_s27, 4  ;;  %s1631_s5 = scalar_lea.hbm %s1677_s4, %s875_s23  ;;  %s1633_s28 = int_to_ptr.vmem [resolvable:$true] %s776_s28 }
  0x1c   : > { %v232_v2 = vld [vmem:[%s218_s7 + $0x20] sm:$0xff]  ;;  %v236_v4 = vcvt.s32.f32 %v228_v1  ;;  %v237_v6 = vcvt.s32.f32 %v229_v3  ;;  %v233_v7 = vld [vmem:[%s218_s7 + $0x28] sm:$0xff]  ;;  %v234_v9 = vld [vmem:[%s218_s7 + $0x30] sm:$0xff]  ;;  %v238_v11 = vcvt.s32.f32 %v230_v8  ;;  %s763_s6 = scalar_lea.sflag [#allocation3], %s205_s20  ;;  %s1056_s19 = smov [#allocation2]  }
  0x1d   : > { %v240_v5 = vcvt.s32.f32 %v232_v2  ;;  %v241_v10 = vcvt.s32.f32 %v233_v7  ;;  %v242_v12 = vcvt.s32.f32 %v234_v9  ;;  %v231_v13 = vld [vmem:[%s218_s7 + $0x18] sm:$0xff]  ;;  %v1154_v17 = vld [vmem:[%s1151_s10 + $0x8] sm:$0xff]  ;;  %v1162_v22 = vld [vmem:[%s1151_s10] sm:$0xff]  ;;  %s995_s8 = sshll.u32 %s1056_s19, 4  ;;  %s996_s8 = int_to_ptr.vmem [resolvable:$false] %s995_s8 }
  0x1e   : > { %v235_v14 = vld [vmem:[%s218_s7 + $0x38] sm:$0xff]  ;;  %889 = vmatprep.mubr.msk.f32.mxu0 %vm245_vm0, %v236_v4  ;;  %v239_v15 = vcvt.s32.f32 %v231_v13  ;;  %v1157_v18 = vld [vmem:[%s1151_s10 + $0x28] sm:$0xff]  ;;  %v475_v19 = vand.u32 2147483647, %v1154_v17  ;;  %v474_v24 = vand.u32 2147483647, %v1162_v22  ;;  %p998_p0 = scmp.lt.s32.totalorder %s1633_s28, %s996_s8 }
  0x1f   : > { %895 = vmatprep.mubr.msk.f32.mxu1 %vm245_vm0, %v240_v5  ;;  %890 = vmatmul.mubr.msk.f32.vlgmr.msra.gmra.mrb[0].mxu0 %vm245_vm0, %v237_v6  ;;  %v243_v16 = vcvt.s32.f32 %v235_v14  ;;  %v479_v20 = vand.u32 2147483647, %v1157_v18  ;;  %v1166_v28 = vld [vmem:[%s1151_s10 + $0x20] sm:$0xff]  ;;  %v1169_v29 = vld [vmem:[%s1151_s10 + $0x18] sm:$0xff]  ;;  %v1183_v42 = vld [vmem:[%s1151_s10 + $0x10] sm:$0xff]  ;;  %v1204_v4 = vshrl.u32 %v414_v62, 7 }
  0x20   : > { %896 = vmatmul.mubr.msk.f32.vlgmr.msra.gmra.mrb[0].mxu1 %vm245_vm0, %v241_v10  ;;  %892 = vmatprep.mubr.msk.f32.mxu0 %vm245_vm0, %v238_v11  ;;  %v483_v21 = vsub.f32 0.0, %v475_v19  ;;  %v482_v27 = vsub.f32 0.0, %v474_v24  ;;  %v478_v30 = vand.u32 2147483647, %v1166_v28  ;;  %v477_v32 = vand.u32 2147483647, %v1169_v29 }
  0x21   : > { %898 = vmatprep.mubr.msk.f32.mxu1 %vm245_vm0, %v242_v12  ;;  %v487_v23 = vsub.f32 0.0, %v479_v20  ;;  %v1174_v35 = vld [vmem:[%s1151_s10 + $0x38] sm:$0xff]  ;;  %v1186_v43 = vld [vmem:[%s1151_s10 + $0x30] sm:$0xff]  ;;  %v476_v46 = vand.u32 2147483647, %v1183_v42  ;;  %v1214_v13 = vadd.s32 8, %v1204_v4  ;;  %v1218_v19 = vstv %s424_s12 }
  0x22   : > { %v492_v25 = vmul.f32 1.442695, %v483_v21  ;;  %v490_v31 = vmul.f32 1.442695, %v482_v27  ;;  %v486_v33 = vsub.f32 0.0, %v478_v30  ;;  %v485_v34 = vsub.f32 0.0, %v477_v32 }
  0x23   : > { %893 = vmatmul.mubr.msk.f32.gmra.mrb[2].mxu0 %vm245_vm0, %v239_v15  ;;  %v500_v26 = vmul.f32 1.442695, %v487_v23  ;;  %1693 = vst [vmem:[#allocation5_spill] sm:$0xff] %v1174_v35  ;;  %v481_v38 = vand.u32 2147483647, %v1174_v35  ;;  %v484_v51 = vsub.f32 0.0, %v476_v46 }
  0x24   : > { %899 = vmatmul.mubr.msk.f32.gmra.mrb[2].mxu1 %vm245_vm0, %v243_v16  ;;  %943 = vpow2.f32 %v492_v25  ;;  %v498_v37 = vmul.f32 1.442695, %v486_v33  ;;  %v496_v40 = vmul.f32 1.442695, %v485_v34  ;;  %v480_v48 = vand.u32 2147483647, %v1186_v43 }
  0x25   : > { %945 = vpow2.f32 %v500_v26  ;;  %v489_v45 = vsub.f32 0.0, %v481_v38  ;;  %v494_v54 = vmul.f32 1.442695, %v484_v51  ;;  %vm547_vm1 = vcmp.ge.f32.partialorder %v1154_v17, 0.0  ;;  %s991_s7 = scalar_lea.vmem %s1633_s28, 128  ;;  %s997_s9 = scalar_lea.vmem %s996_s8, 256 }
  0x26   : > { %947 = vpow2.f32 %v490_v31  ;;  %v488_v52 = vsub.f32 0.0, %v480_v48  ;;  %v1242_v38 = vadd.s32 40, %v1204_v4  ;;  %vm551_vm3 = vcmp.ge.f32.partialorder %v1157_v18, 0.0  ;;  %p992_p11 = scmp.ne.s32.totalorder %s1633_s28, %s991_s7  ;;  %p999_p1 = scmp.lt.s32.totalorder %s997_s9, %s991_s7 }
  0x27   : > { %949 = vpow2.f32 %v498_v37  ;;  %v504_v49 = vmul.f32 1.442695, %v489_v45  ;;  %vm546_vm4 = vcmp.ge.f32.partialorder %v1162_v22, 0.0  ;;  %vm550_vm7 = vcmp.ge.f32.partialorder %v1166_v28, 0.0 }
  0x28   : > { %951 = vpow2.f32 %v496_v40  ;;  %v502_v55 = vmul.f32 1.442695, %v488_v52  ;;  %vm549_vm9 = vcmp.ge.f32.partialorder %v1169_v29, 0.0  ;;  %vm553_vm12 = vcmp.ge.f32.partialorder %v1174_v35, 0.0  ;;  %p993_p12 = pnand %p992_p11, %p1120_p5  ;;  %p1000_p2 = por %p999_p1, %p998_p0 }
  0x2a   : > { %p994_p13 = pneg %p993_p12 }
  0x2c   : > { %p1001_p3 = pnand %p1000_p2, %p994_p13 }
  0x2e   : > { %v1176_v36 = vpop.eup %943 }
  0x2f   : > { %v1179_v39 = vpop.eup %945  ;;  %v507_v41 = vadd.f32 1.0, %v1176_v36  ;;  %v670_v3 = vmul.f32 -0.5, %v1176_v36  ;;  %v673_v14 = vand.u32 2147483647, %v1176_v36 }
  0x30   : > { %v511_v44 = vadd.f32 1.0, %v1179_v39  ;;  %v1190_v47 = vpop.eup %947  ;;  %v706_v24 = vmul.f32 -0.5, %v1179_v39 }
  0x31   : > { %953 = vrcp.f32 %v507_v41  ;;  %v506_v50 = vadd.f32 1.0, %v1190_v47  ;;  %v1194_v53 = vpop.eup %949  ;;  %v671_v11 = vadd.f32 1.0, %v670_v3  ;;  %v661_v32 = vmul.f32 -0.5, %v1190_v47 }
  0x32   : > { %955 = vrcp.f32 %v511_v44  ;;  %v1196_v56 = vpop.eup %951  ;;  %v510_v58 = vadd.f32 1.0, %v1194_v53  ;;  %vm1236_vm2 = vcmp.lt.f32.partialorder %v673_v14, 0.0004427343  ;;  %v664_v52 = vand.u32 2147483647, %v1190_v47 }
  0x33   : > { %957 = vpow2.f32 %v504_v49  ;;  %v509_v60 = vadd.f32 1.0, %v1196_v56  ;;  %v1233_v31 = vmul.f32 %v1176_v36, %v671_v11  ;;  %v709_v49 = vand.u32 2147483647, %v1179_v39 }
  0x34   : > { %959 = vrcp.f32 %v506_v50  ;;  %vm1282_vm6 = vcmp.lt.f32.partialorder %v664_v52, 0.0004427343 }
  0x35   : > { %961 = vpow2.f32 %v494_v54  ;;  %vm1272_vm5 = vcmp.lt.f32.partialorder %v709_v49, 0.0004427343 }
  0x36   : > { %963 = vpow2.f32 %v502_v55 }
  0x37   : > { %965 = vlog2.f32 %v507_v41 }
  0x38   : > { %967 = vrcp.f32 %v510_v58 }
  0x39   : > { %969 = vrcp.f32 %v509_v60 }
  0x3a   : > { %971 = vlog2.f32 %v506_v50 }
  0x3b   : > { %v954_v57 = vpop.eup %953  ;;  %973 = vlog2.f32 %v511_v44 }
  0x3c   : > { %v956_v59 = vpop.eup %955  ;;  %v523_v61 = vmul.f32 %v954_v57, %v507_v41 }
  0x3d   : > { %v527_v63 = vmul.f32 %v956_v59, %v511_v44  ;;  %v1200_v0 = vpop.eup %957  ;;  %v707_v44 = vadd.f32 1.0, %v706_v24 }
  0x3e   : > { %v960_v1 = vpop.eup %959  ;;  %v531_v2 = vsub.f32 2.0, %v523_v61  ;;  %v1207_v6 = vadd.f32 1.0, %v1200_v0 }
  0x3f   : > { %v535_v5 = vsub.f32 2.0, %v527_v63  ;;  %v522_v7 = vmul.f32 %v960_v1, %v506_v50  ;;  %v1209_v8 = vpop.eup %961  ;;  %v662_v50 = vadd.f32 1.0, %v661_v32 }
  0x40   : > { %v539_v9 = vmul.f32 %v954_v57, %v531_v2  ;;  %v1211_v10 = vpop.eup %963  ;;  %975 = vrcp.f32 %v1207_v6  ;;  %v1221_v21 = vadd.f32 1.0, %v1209_v8  ;;  %v679_v52 = vmul.f32 -0.5, %v1209_v8 }
  0x41   : > { %v966_v12 = vpop.eup %965  ;;  %v543_v15 = vmul.f32 %v956_v59, %v535_v5  ;;  %v530_v20 = vsub.f32 2.0, %v522_v7  ;;  %v1227_v25 = vadd.f32 1.0, %v1211_v10  ;;  %977 = vlog2.f32 %v510_v58 }
  0x42   : > { %v968_v16 = vpop.eup %967  ;;  %v555_v23 = vmul.f32 %v1176_v36, %v539_v9  ;;  %v1230_v30 = vmul.f32 0.6931472, %v966_v12  ;;  %979 = vrcp.f32 %v1221_v21  ;;  %v697_v59 = vmul.f32 -0.5, %v1194_v53 }
  0x43   : > { %v970_v26 = vpop.eup %969  ;;  %v559_v34 = vmul.f32 %v1179_v39, %v543_v15  ;;  %v526_v37 = vmul.f32 %v968_v16, %v510_v58  ;;  %v538_v40 = vmul.f32 %v960_v1, %v530_v20  ;;  %981 = vrcp.f32 %v1227_v25 }
  0x44   : > { %v972_v36 = vpop.eup %971  ;;  %v1248_v41 = vsel %vm547_vm1, %v539_v9, %v555_v23  ;;  %v525_v45 = vmul.f32 %v970_v26, %v509_v60  ;;  %983 = vlog2.f32 %v509_v60  ;;  %v1268_v60 = vmul.f32 %v1179_v39, %v707_v44 }
  0x45   : > { %v974_v46 = vpop.eup %973  ;;  %v1256_v51 = vsel %vm551_vm3, %v543_v15, %v559_v34  ;;  %v534_v54 = vsub.f32 2.0, %v526_v37  ;;  %985 = vlog2.f32 %v1207_v6  ;;  %v554_v55 = vmul.f32 %v1190_v47, %v538_v40 }
  0x46   : > { %v1262_v58 = vmul.f32 0.6931472, %v972_v36  ;;  %v1265_v62 = vmul.f32 0.6931472, %v974_v46  ;;  %v533_v63 = vsub.f32 2.0, %v525_v45  ;;  %v1277_v3 = vmul.f32 %v1190_v47, %v662_v50 }
  0x47   : > { %v1280_v5 = vadd.s32 32, %v1204_v4  ;;  %v542_v39 = vmul.f32 %v968_v16, %v534_v54  ;;  %v688_v9 = vmul.f32 -0.5, %v1196_v56  ;;  %987 = vlog2.f32 %v1221_v21 }
  0x48   : > { %v1288_v11 = vsel %vm546_vm4, %v538_v40, %v554_v55  ;;  %v698_v12 = vadd.f32 1.0, %v697_v59  ;;  %v724_v47 = vmul.f32 -0.5, %v1200_v0  ;;  %v700_v16 = vand.u32 2147483647, %v1194_v53 }
  0x49   : > { %v541_v23 = vmul.f32 %v970_v26, %v533_v63  ;;  %v691_v34 = vand.u32 2147483647, %v1196_v56  ;;  %989 = vlog2.f32 %v1227_v25  ;;  %v558_v40 = vmul.f32 %v1194_v53, %v542_v39 }
  0x4a   : > { %v976_v61 = vpop.eup %975  ;;  %v689_v44 = vadd.f32 1.0, %v688_v9  ;;  %v1311_v46 = vmul.f32 %v1194_v53, %v698_v12  ;;  %v725_v50 = vadd.f32 1.0, %v724_v47  ;;  %vm1314_vm8 = vcmp.lt.f32.partialorder %v700_v16, 0.0004427343 }
  0x4b   : > { %v529_v14 = vmul.f32 %v976_v61, %v1207_v6  ;;  %v978_v15 = vpop.eup %977  ;;  %v1303_v6 = vadd.s32 24, %v1204_v4  ;;  %v557_v59 = vmul.f32 %v1196_v56, %v541_v23  ;;  %v727_v63 = vand.u32 2147483647, %v1200_v0 }
  0x4c   : > { %v980_v24 = vpop.eup %979  ;;  %v1321_v9 = vmul.f32 0.6931472, %v978_v15  ;;  %vm1324_vm10 = vcmp.lt.f32.partialorder %v691_v34, 0.0004427343  ;;  %v1336_v16 = vmul.f32 %v1196_v56, %v689_v44  ;;  %v1342_v34 = vmul.f32 %v1200_v0, %v725_v50 }
  0x4d   : > { %v982_v37 = vpop.eup %981  ;;  %v537_v49 = vsub.f32 2.0, %v529_v14  ;;  %v524_v26 = vmul.f32 %v980_v24, %v1221_v21  ;;  %v1331_v14 = vsel %vm550_vm7, %v542_v39, %v558_v40  ;;  %v715_v21 = vmul.f32 -0.5, %v1211_v10 }
  0x4e   : > { %v984_v45 = vpop.eup %983  ;;  %v528_v12 = vmul.f32 %v982_v37, %v1227_v25  ;;  %1706 = vst [vmem:[#allocation8_spill] sm:$0xff] %v1342_v34  ;;  %v680_v32 = vadd.f32 1.0, %v679_v52  ;;  %v1344_v25 = vsel %vm549_vm9, %v541_v23, %v557_v59  ;;  %v1347_v39 = vadd.s32 56, %v1204_v4 }
  0x4f   : > { %v986_v54 = vpop.eup %985  ;;  %v1333_v47 = vmul.f32 0.6931472, %v984_v45  ;;  %v545_v15 = vmul.f32 %v976_v61, %v537_v49  ;;  %vm1349_vm11 = vcmp.lt.f32.partialorder %v727_v63, 0.0004427343  ;;  %v1708_v40 = vmov 0 }
  0x50   : > { %v1339_v36 = vmul.f32 0.6931472, %v986_v54  ;;  %1707 = vst [vmem:[#allocation9_spill] sm:$0xff] %v1347_v39  ;;  %v1709_v40 = vsel %vm1349_vm11, 4294967295, %v1708_v40  ;;  %v532_v56 = vsub.f32 2.0, %v524_v26  ;;  %v536_v45 = vsub.f32 2.0, %v528_v12 }
  0x51   : > { %1704 = vst [vmem:[#allocation6_spill] sm:$0xff] %v1333_v47  ;;  %v988_v57 = vpop.eup %987  ;;  %1710 = vst [vmem:[#allocation10_spill] sm:$0xff] %v1709_v40  ;;  %v1356_v61 = vld [vmem:[%s1676_s3] ss:$0 sm:$0xff]  ;;  %v716_v52 = vadd.f32 1.0, %v715_v21  ;;  %v561_v44 = vmul.f32 %v1200_v0, %v545_v15  ;;  %v1382_v26 = vmul.f32 %v1209_v8, %v680_v32  ;;  %v1681_v12 = vmov 0.0  }
  0x52   : > { %1705 = vst [vmem:[#allocation7_spill] sm:$0xff] %v1339_v36  ;;  %v1379_v23 = vmul.f32 0.6931472, %v988_v57  ;;  %v1392_v0 = vmul.f32 %v980_v24, %v532_v56  ;;  %v1399_v20 = vmul.f32 %v982_v37, %v536_v45  ;;  %vm427_vm3 = vcmp.lt.s32.totalorder %v1214_v13, %v1218_v19 }
  0x53   : > { %v990_v54 = vpop.eup %989  ;;  %1712 = vst [vmem:[#allocation12_spill] sm:$0xff] %v1382_v26  ;;  %v1404_v26 = vmul.f32 %v1211_v10, %v716_v52  ;;  %v718_v52 = vand.u32 2147483647, %v1211_v10  ;;  %vm431_vm7 = vcmp.lt.s32.totalorder %v1242_v38, %v1218_v19 }
  0x54   : > { %1711 = vst [vmem:[#allocation11_spill] sm:$0xff] %v1379_v23  ;;  %1713 = vst [vmem:[#allocation13_spill] sm:$0xff] %v1392_v0  ;;  %v1401_v27 = vmul.f32 0.6931472, %v990_v54  ;;  %v1415_v54 = vsel %vm553_vm12, %v545_v15, %v561_v44  ;;  %vm426_vm12 = vcmp.lt.s32.totalorder %v1204_v4, %v1218_v19 }
  0x55   : > { %1714 = vst [vmem:[#allocation14_spill] sm:$0xff] %v1399_v20  ;;  %1716 = vst [vmem:[#allocation16_spill] sm:$0xff] %v1404_v26 }
  0x56   : > { %1715 = vst [vmem:[#allocation15_spill] sm:$0xff] %v1401_v27  ;;  %1717 = vst [vmem:[#allocation17_spill] sm:$0xff] %v1415_v54  ;;  %v1423_v27 = vmul.f32 %v1209_v8, %v1392_v0 }
  0x58   : > { %1719 = vst [vmem:[#allocation19_spill] sm:$0xff] %v1423_v27 }
  0x5c   : > { %v1762_v55 = vld [vmem:[#allocation14_spill] sm:$0xff] }
  0xf2   : > { %v1370_v59 = vpop.f32.mrb[0].mxu0 }
  0xf3   : > { %v1372_v63 = vpop.f32.mrb[0].mxu1  ;;  %vm383_vm13 = vcmp.eq.f32.partialorder %v1370_v59, %v1356_v61  ;;  %v1388_v21 = vpop.f32.mrb[1].mxu0  ;;  %vm407_vm1 = vcmp.ge.f32.partialorder %v1370_v59, 0.0 }
  0xf4   : > { %vm387_vm14 = vcmp.eq.f32.partialorder %v1372_v63, %v1356_v61  ;;  %v1390_v49 = vpop.f32.mrb[1].mxu1  ;;  %v866_v57 = vsel %vm383_vm13, 1.0, %v1681_v12  ;;  %vm382_vm15 = vcmp.eq.f32.partialorder %v1388_v21, %v1356_v61  ;;  %vm411_vm4 = vcmp.ge.f32.partialorder %v1372_v63, 0.0 }
  0xf5   : > { %v870_v32 = vsel %vm387_vm14, 1.0, %v1681_v12  ;;  %v459_v48 = vmul.f32 0.8933333, %v866_v57  ;;  %v611_v24 = vmul.f32 -0.5, %v866_v57  ;;  %v865_v50 = vsel %vm382_vm15, 1.0, %v1681_v12  ;;  %vm1499_vm14 = vmand %vm407_vm1, %vm427_vm3 }
  0xf6   : > { %v463_v1 = vmul.f32 0.8933333, %v870_v32  ;;  %v615_v56 = vmul.f32 -0.5, %v870_v32  ;;  %vm386_vm0 = vcmp.eq.f32.partialorder %v1390_v49, %v1356_v61  ;;  %v1409_v23 = vpop.f32.mrb[2].mxu0  ;;  %v458_v26 = vmul.f32 0.8933333, %v865_v50  ;;  %vm1511_vm15 = vmand %vm411_vm4, %vm431_vm7 }
  0xf7   : > { %v1411_v36 = vpop.f32.mrb[2].mxu1  ;;  %v467_v37 = vadd.f32 0.006666667, %v459_v48  ;;  %v869_v57 = vsel %vm386_vm0, 1.0, %v1681_v12  ;;  %v1419_v32 = vpop.f32.mrb[3].mxu0  ;;  %v1429_v48 = vmul.f32 %v1211_v10, %v1399_v20  ;;  %v619_v12 = vadd.f32 0.75, %v611_v24 }
  0xf8   : > { %v471_v45 = vadd.f32 0.006666667, %v463_v1  ;;  %1718 = vst [vmem:[#allocation18_spill] sm:$0xff] %v1419_v32  ;;  %v1425_v34 = vpop.f32.mrb[3].mxu1  ;;  %v623_v0 = vadd.f32 0.75, %v615_v56  ;;  %vm385_vm9 = vcmp.eq.f32.partialorder %v1409_v23, %v1356_v61  ;;  %vm548_vm0 = vcmp.ge.f32.partialorder %v1183_v42, 0.0 }
  0xf9   : > { %1720 = vst [vmem:[#allocation20_spill] sm:$0xff] %v1425_v34  ;;  %1721 = vst [vmem:[#allocation21_spill] sm:$0xff] %v1429_v48  ;;  %v571_v1 = vmul.f32 2.0, %v467_v37  ;;  %v643_v15 = vmul.f32 %v467_v37, %v1154_v17  ;;  %v466_v27 = vadd.f32 0.006666667, %v458_v26  ;;  %v1722_v34 = vmax.f32 %v1154_v17, 0.0 }
  0xfa   : > { %v575_v44 = vmul.f32 2.0, %v471_v45  ;;  %v647_v40 = vmul.f32 %v471_v45, %v1157_v18  ;;  %v462_v54 = vmul.f32 0.8933333, %v869_v57  ;;  %v1723_v48 = vmax.f32 %v1157_v18, 0.0 }
  0xfb   : > { %v579_v39 = vsub.f32 1.0, %v571_v1  ;;  %v651_v10 = vsub.f32 %v1722_v34, %v643_v15  ;;  %v570_v32 = vmul.f32 2.0, %v466_v27  ;;  %v642_v47 = vmul.f32 %v466_v27, %v1162_v22 }
  0xfc   : > { %v583_v20 = vsub.f32 1.0, %v575_v44  ;;  %v655_v35 = vsub.f32 %v1723_v48, %v647_v40  ;;  %v470_v24 = vadd.f32 0.006666667, %v462_v54  ;;  %v1724_v17 = vsel %vm1236_vm2, %v1233_v31, %v1230_v30 }
  0xfd   : > { %v587_v26 = vmul.f32 %v579_v39, %v1248_v41  ;;  %v731_v34 = vadd.f32 %v1724_v17, %v651_v10  ;;  %v1725_v18 = vsel %vm1272_vm5, %v1268_v60, %v1265_v62  ;;  %v578_v54 = vsub.f32 1.0, %v570_v32 }
  0xfe   : > { %v591_v56 = vmul.f32 %v583_v20, %v1256_v51  ;;  %v735_v40 = vadd.f32 %v1725_v18, %v655_v35  ;;  %v1726_v41 = vmax.f32 %v1162_v22, 0.0  ;;  %v574_v33 = vmul.f32 2.0, %v470_v24 }
  0xff   : > { %v646_v48 = vmul.f32 %v470_v24, %v1166_v28  ;;  %v595_v30 = vadd.f32 %v587_v26, %v467_v37  ;;  %v610_v1 = vmul.f32 -0.5, %v865_v50  ;;  %v1727_v51 = vmov 0.0  }
 0x100   : > { %v650_v39 = vsub.f32 %v1726_v41, %v642_v47  ;;  %v599_v31 = vadd.f32 %v591_v56, %v471_v45  ;;  %v868_v20 = vsel %vm385_vm9, 1.0, %v1727_v51  ;;  %v586_v2 = vmul.f32 %v578_v54, %v1288_v11 }
 0x101   : > { %v1728_v35 = vsel %vm1282_vm6, %v1277_v3, %v1262_v58  ;;  %vm430_vm2 = vcmp.lt.s32.totalorder %v1280_v5, %v1218_v19  ;;  %v582_v22 = vsub.f32 1.0, %v574_v33  ;;  %v1729_v60 = vmax.f32 %v1166_v28, 0.0 }
 0x102   : > { %v730_v62 = vadd.f32 %v1728_v35, %v650_v39  ;;  %v603_v37 = vmul.f32 %v595_v30, %v595_v30  ;;  %v607_v45 = vmul.f32 %v599_v31, %v599_v31  ;;  %v614_v50 = vmul.f32 -0.5, %v869_v57  ;;  %v1741_v30 = vld [vmem:[#allocation6_spill] sm:$0xff] }
 0x103   : > { %v654_v47 = vsub.f32 %v1729_v60, %v646_v48  ;;  %v461_v32 = vmul.f32 0.8933333, %v868_v20  ;;  %v594_v15 = vadd.f32 %v586_v2, %v466_v27  ;;  %v590_v11 = vmul.f32 %v582_v22, %v1331_v14 }
 0x104   : > { %v1730_v58 = vsel %vm1314_vm8, %v1311_v46, %v1321_v9  ;;  %vm389_vm5 = vcmp.eq.f32.partialorder %v1411_v36, %v1356_v61  ;;  %v627_v7 = vmul.f32 %v619_v12, %v603_v37  ;;  %v631_v44 = vmul.f32 %v623_v0, %v607_v45 }
 0x105   : > { %v734_v3 = vadd.f32 %v1730_v58, %v654_v47  ;;  %vm406_vm6 = vcmp.ge.f32.partialorder %v1388_v21, 0.0  ;;  %v469_v28 = vadd.f32 0.006666667, %v461_v32  ;;  %v602_v10 = vmul.f32 %v594_v15, %v594_v15  ;;  %v1748_v47 = vld [vmem:[#allocation9_spill] sm:$0xff] }
 0x106   : > { %v618_v57 = vadd.f32 0.75, %v610_v1  ;;  %v598_v26 = vadd.f32 %v590_v11, %v470_v24  ;;  %v872_v27 = vsel %vm389_vm5, 1.0, %v1727_v51  ;;  %v1731_v14 = vand.u32 2147483647, %v1209_v8  ;;  %vm450_vm7 = vmand %vm406_vm6, %vm426_vm12  ;;  %v1743_v1 = vld [vmem:[#allocation18_spill] sm:$0xff] }
 0x107   : > { %vm1490_vm8 = vcmp.lt.f32.partialorder %v718_v52, 0.0004427343  ;;  %v739_v12 = vmul.f32 %v731_v34, %v627_v7  ;;  %v1503_v0 = vmul.f32 %v735_v40, %v631_v44  ;;  %v573_v8 = vmul.f32 2.0, %v469_v28  ;;  %v1752_v44 = vld [vmem:[#allocation8_spill] sm:$0xff] }
 0x108   : > { %vm1486_vm13 = vcmp.lt.f32.partialorder %v1731_v14, 0.0004427343  ;;  %v645_v24 = vmul.f32 %v469_v28, %v1169_v29  ;;  %v626_v13 = vmul.f32 %v618_v57, %v602_v10  ;;  %v606_v59 = vmul.f32 %v598_v26, %v598_v26 }
 0x109   : > { %v622_v17 = vadd.f32 0.75, %v614_v50  ;;  %v465_v56 = vmul.f32 0.8933333, %v872_v27  ;;  %vm552_vm1 = vcmp.ge.f32.partialorder %v1186_v43, 0.0  ;;  %v747_v34 = vsel %vm1499_vm14, %v739_v12, 0.0  ;;  %v1755_v12 = vld [vmem:[#allocation11_spill] sm:$0xff] }
 0x10a   : > { %v751_v38 = vsel %vm1511_vm15, %v1503_v0, 0.0  ;;  %vm429_vm3 = vcmp.lt.s32.totalorder %v1303_v6, %v1218_v19  ;;  %v581_v63 = vsub.f32 1.0, %v573_v8  ;;  %v1740_v18 = vmax.f32 %v1169_v29, 0.0  ;;  %v1756_v8 = vld [vmem:[#allocation12_spill] sm:$0xff] }
 0x10b   : > { %v738_v54 = vmul.f32 %v730_v62, %v626_v13  ;;  %vm410_vm4 = vcmp.ge.f32.partialorder %v1390_v49, 0.0  ;;  %v630_v41 = vmul.f32 %v622_v17, %v606_v59  ;;  %v473_v39 = vadd.f32 0.006666667, %v465_v56  ;;  %v1744_v62 = vld [vmem:[#allocation5_spill] sm:$0xff] }
 0x10c   : > { %v653_v40 = vsub.f32 %v1740_v18, %v645_v24  ;;  %v589_v33 = vmul.f32 %v581_v63, %v1344_v25  ;;  %v613_v48 = vmul.f32 -0.5, %v868_v20  ;;  %v1742_v29 = vsel %vm1324_vm10, %v1336_v16, %v1741_v30  ;;  %vm1548_vm12 = vmand %vm410_vm4, %vm430_vm2  ;;  %v1747_v20 = vld [vmem:[#allocation20_spill] sm:$0xff]  ;;  %v1757_v24 = vld [vmem:[#allocation15_spill] sm:$0xff] }
 0x10d   : > { %vm384_vm9 = vcmp.eq.f32.partialorder %v1743_v1, %v1356_v61  ;;  %v746_v49 = vsel %vm450_vm7, %v738_v54, 0.0  ;;  %v1540_v2 = vmul.f32 %v734_v3, %v630_v41  ;;  %v577_v35 = vmul.f32 2.0, %v473_v39  ;;  %v1750_v3 = vld [vmem:[#allocation17_spill] sm:$0xff] }
 0x10e   : > { %v733_v31 = vadd.f32 %v1742_v29, %v653_v40  ;;  %v649_v22 = vmul.f32 %v473_v39, %v1744_v62  ;;  %v1543_v21 = vadd.f32 %v747_v34, %v746_v49  ;;  %v597_v16 = vadd.f32 %v589_v33, %v469_v28  ;;  %v1753_v28 = vld [vmem:[#allocation7_spill] sm:$0xff]  ;;  %v1761_v41 = vld [vmem:[#allocation21_spill] sm:$0xff] }
 0x10f   : > { %v867_v25 = vsel %vm384_vm9, 1.0, %v1727_v51  ;;  %vm388_vm10 = vcmp.eq.f32.partialorder %v1747_v20, %v1356_v61  ;;  %v750_v60 = vsel %vm1548_vm12, %v1540_v2, 0.0  ;;  %vm433_vm5 = vcmp.lt.s32.totalorder %v1748_v47, %v1218_v19  ;;  %v1759_v40 = vld [vmem:[#allocation19_spill] sm:$0xff] }
 0x110   : > { %v585_v37 = vsub.f32 1.0, %v577_v35  ;;  %v1749_v5 = vmax.f32 %v1744_v62, 0.0  ;;  %v460_v50 = vmul.f32 0.8933333, %v867_v25  ;;  %v605_v32 = vmul.f32 %v597_v16, %v597_v16 }
 0x111   : > { %v621_v15 = vadd.f32 0.75, %v613_v48  ;;  %v617_v11 = vmul.f32 -0.5, %v872_v27  ;;  %v871_v58 = vsel %vm388_vm10, 1.0, %v1727_v51  ;;  %v1754_v10 = vsel %vm1349_vm11, %v1752_v44, %v1753_v28  ;;  %v1758_v51 = vld [vmem:[#allocation16_spill] sm:$0xff] }
 0x112   : > { %v657_v45 = vsub.f32 %v1749_v5, %v649_v22  ;;  %v593_v7 = vmul.f32 %v585_v37, %v1750_v3  ;;  %v468_v26 = vadd.f32 0.006666667, %v460_v50  ;;  %v464_v14 = vmul.f32 0.8933333, %v871_v58 }
 0x113   : > { %vm409_vm2 = vcmp.ge.f32.partialorder %v1409_v23, 0.0  ;;  %v629_v9 = vmul.f32 %v621_v15, %v605_v32  ;;  %v684_v27 = vsel %vm1486_vm13, %v1756_v8, %v1755_v12  ;;  %v720_v13 = vsel %vm1490_vm8, %v1758_v51, %v1757_v24  ;;  %v1760_v23 = vld [vmem:[#allocation13_spill] sm:$0xff] }
 0x114   : > { %v737_v57 = vadd.f32 %v1754_v10, %v657_v45  ;;  %v601_v59 = vadd.f32 %v593_v7, %v473_v39  ;;  %v572_v17 = vmul.f32 2.0, %v468_v26  ;;  %v644_v56 = vmul.f32 %v468_v26, %v1183_v42  ;;  %vm1590_vm11 = vmand %vm409_vm2, %vm429_vm3 }
 0x115   : > { %v472_v34 = vadd.f32 0.006666667, %v464_v14  ;;  %v741_v63 = vmul.f32 %v733_v31, %v629_v9  ;;  %v625_v18 = vadd.f32 0.75, %v617_v11  ;;  %v564_v54 = vsel %vm548_vm0, %v1760_v23, %v1759_v40 }
 0x116   : > { %v568_v33 = vsel %vm552_vm1, %v1762_v55, %v1761_v41  ;;  %v609_v39 = vmul.f32 %v601_v59, %v601_v59  ;;  %v580_v48 = vsub.f32 1.0, %v572_v17  ;;  %v1765_v30 = vmax.f32 %v1183_v42, 0.0 }
 0x117   : > { %v576_v31 = vmul.f32 2.0, %v472_v34  ;;  %v749_v49 = vsel %vm1590_vm11, %v741_v63, 0.0  ;;  %vm413_vm6 = vcmp.ge.f32.partialorder %v1411_v36, 0.0  ;;  %v612_v35 = vmul.f32 -0.5, %v867_v25 }
 0x118   : > { %v652_v29 = vsub.f32 %v1765_v30, %v644_v56  ;;  %v648_v62 = vmul.f32 %v472_v34, %v1186_v43  ;;  %v633_v22 = vmul.f32 %v625_v18, %v609_v39  ;;  %v588_v6 = vmul.f32 %v580_v48, %v564_v54  ;;  %vm1606_vm13 = vmand %vm413_vm6, %vm433_vm5 }
 0x119   : > { %v584_v37 = vsub.f32 1.0, %v576_v31  ;;  %v417_v5 = vadd.s32 16, %v1204_v4  ;;  %v1766_v45 = vmax.f32 %v1186_v43, 0.0  ;;  %v616_v11 = vmul.f32 -0.5, %v871_v58 }
 0x11a   : > { %v732_v16 = vadd.f32 %v684_v27, %v652_v29  ;;  %v745_v42 = vmul.f32 %v737_v57, %v633_v22  ;;  %v596_v32 = vadd.f32 %v588_v6, %v468_v26  ;;  %v421_v25 = vadd.s32 48, %v1204_v4 }
 0x11b   : > { %v656_v50 = vsub.f32 %v1766_v45, %v648_v62  ;;  %v592_v15 = vmul.f32 %v584_v37, %v568_v33  ;;  %v620_v61 = vadd.f32 0.75, %v612_v35  ;;  %vm428_vm8 = vcmp.lt.s32.totalorder %v417_v5, %v1218_v19 }
 0x11c   : > { %v753_v7 = vsel %vm1606_vm13, %v745_v42, 0.0  ;;  %v604_v43 = vmul.f32 %v596_v32, %v596_v32  ;;  %vm408_vm14 = vcmp.ge.f32.partialorder %v1743_v1, 0.0  ;;  %v624_v28 = vadd.f32 0.75, %v616_v11 }
 0x11d   : > { %v736_v3 = vadd.f32 %v720_v13, %v656_v50  ;;  %v600_v44 = vadd.f32 %v592_v15, %v472_v34  ;;  %vm412_vm0 = vcmp.ge.f32.partialorder %v1747_v20, 0.0  ;;  %vm432_vm1 = vcmp.lt.s32.totalorder %v421_v25, %v1218_v19  ;;  %vm452_vm3 = vmand %vm408_vm14, %vm428_vm8 }
 0x11e   : > { %v628_v58 = vmul.f32 %v620_v61, %v604_v43  ;;  %vm456_vm4 = vmand %vm412_vm0, %vm432_vm1 }
 0x11f   : > { %v608_v47 = vmul.f32 %v600_v44, %v600_v44 }
 0x120   : > { %v740_v10 = vmul.f32 %v732_v16, %v628_v58 }
 0x121   : > { %v632_v4 = vmul.f32 %v624_v28, %v608_v47 }
 0x122   : > { %v748_v57 = vsel %vm452_vm3, %v740_v10, 0.0 }
 0x123   : > { %v744_v26 = vmul.f32 %v736_v3, %v632_v4  ;;  %v755_v14 = vadd.f32 %v1543_v21, %v748_v57 }
 0x125   : > { %v752_v9 = vsel %vm456_vm4, %v744_v26, 0.0  ;;  %v756_v1 = vadd.f32 %v755_v14, %v749_v49 }
 0x127   : > { %v757_v12 = vadd.f32 %v756_v1, %v750_v60 }
 0x129   : > { %v758_v19 = vadd.f32 %v757_v12, %v751_v38 }
 0x12b   : > { %v759_v20 = vadd.f32 %v758_v19, %v752_v9 }
 0x12d   : > { %v760_v21 = vadd.f32 %v759_v20, %v753_v7 }
 0x12f   : > { %761 = vst [vmem:[%s207_s27] sm:$0xff] %v760_v21 }
 0x130   : > { %1004 = shalt.err (!%p1001_p3)
}
 0x131   : > { %s1005_s10 = scalar_lea.hbm %s1631_s5, 128  ;;  %s1009_s13 = scalar_lea.hbm %s1677_s4, 256 }
 0x132   : > { %p1006_p4 = scmp.ne.s32.totalorder %s1631_s5, %s1005_s10  ;;  %p1010_p9 = scmp.lt.u32.totalorder %s1631_s5, %s1677_s4 }
 0x133   : > { %p1011_p10 = scmp.lt.u32.totalorder %s1009_s13, %s1005_s10  ;;  %p1013_p12 = scmp.lt.u32.totalorder %s1005_s10, %s1631_s5 }
 0x134   : > { %p1007_p7 = pnand %p1006_p4, %p1120_p5 }
 0x135   : > { %p1012_p11 = por %p1011_p10, %p1010_p9 }
 0x136   : > { %p1008_p8 = pneg %p1007_p7 }
 0x137   : > { %p1014_p13 = por %p1013_p12, %p1012_p11 }
 0x139   : > { %p1015_p0 = pnand %p1014_p13, %p1008_p8 }
 0x13b   : > { %1018 = shalt.err (!%p1015_p0)
}
 0x13c   : > { %903 = dma.vmem_to_hbm [thread:$0]  (%p1120_p5), %s1633_s28, 128, %s1631_s5, %s763_s6  }
 0x13d PF: > { %p909_p1 = scmp.ge.s32.totalorder %s1053_s18, 2  ;;  %s788_s22 = sand.u32 1, %s1041_s15  }
 0x13e   : > { %s789_s23 = scalar_lea.sflag [#allocation3], %s788_s22 }
 0x13f   : > { %p906_p2 = pnand %p909_p1, %p1124_p6 }
 0x141   : > { %1036 = dma.done.wait (!%p906_p2), %s789_s23, 128  }
 0x142   : > { %1038 = vsyncadd (!%p906_p2), %s789_s23, 4294967168  ;;  %p14_p3 = scmp.ge.s32.totalorder %s1107_s21, 4   ;;  %s1769_s15 = smov %s1045_s16 }
 0x143   : > { %s1770_s16 = smov %s1049_s17  ;;  %s1771_s17 = smov %s1118_s24 }
 0x144   : > { %s1772_s18 = smov %s1107_s21  ;;  %16 = sbr.rel (!%p14_p3) target bundleno = 3 (0x3), region = 74 }
 0x14b   :  { %794 = vsyncpa [#allocation3], 1 }
 0x14c   :  { %796 = vsyncpa [#allocation3 + $0x1], 1 }

</bundles_post_ra>
